<compile_context>
chip_gen: v6e
topology: v6e:2x2x1
jax: 0.10.0
libtpu: 0.0.40
codegen_flags: <defaults>
</compile_context>

<pallas_src>
import functools

import jax
import jax.numpy as jnp
from jax.experimental import pallas as pl
from jax.experimental.pallas import tpu as pltpu

MIN_P = 1e-11


def _round_up(x, m):
    return (x + m - 1) // m * m


def _mvg_kernel(x_ref, w_ref, b_ref, mu_ref, sigma_ref):
    d_out = mu_ref.shape[-1]
    # [tm, D_in] @ [D_in, 2*D_out] with f32 accumulation on the MXU.
    y = jnp.dot(x_ref[...], w_ref[...], preferred_element_type=jnp.float32)
    y = y + b_ref[...]                                # bias broadcast over rows
    mu_ref[...] = y[:, :d_out].astype(mu_ref.dtype)
    s = y[:, d_out:]
    # sigma = elu(s) + 1 + min_p == where(s > 0, s + 1, exp(s)) + min_p
    # NOTE: exp(s) is also evaluated in the untaken lanes (jnp.where is a lane
    # select) so an inf there is simply discarded.  Do NOT refactor this to
    # arithmetic masking (mask * exp(s)) — that would turn inf * 0 into NaN.
    sigma_ref[...] = (jnp.where(s > 0, s + 1.0, jnp.exp(s)) + MIN_P).astype(
        sigma_ref.dtype)


def fuse_params(w_mu, b_mu, w_sigma, b_sigma):
    """One-time (module-init) fusion of the two heads into a single matmul."""
    w_cat = jnp.concatenate([w_mu, w_sigma], axis=1)                 # [D_in, 2*D_out]
    b_cat = jnp.concatenate([b_mu, b_sigma], axis=0).reshape(1, -1)  # [1, 2*D_out]
    return w_cat, b_cat.astype(jnp.float32)


def _pick_row_tile(batch, d_in, d_out, in_itemsize, block_b):
    """Row-tile size: VMEM-budget derived, sublane-rounded, >=2 blocks if possible."""
    sub = 16 if in_itemsize == 2 else 8
    if block_b is not None:
        tm = max(sub, _round_up(int(block_b), sub))       # validate user input
    else:
        # Double-buffered x tile + two f32 output tiles + (double-buffered)
        # resident fused weight.  20 MiB budget is safe on v5e/v6e and within
        # v7x's 64 MiB physical VMEM.
        budget = 20 * 1024 * 1024
        w_bytes = 2 * (d_in * 2 * d_out * in_itemsize + 2 * d_out * 4)
        per_row = 2 * (d_in * in_itemsize + 2 * d_out * 4)
        tm = (max(budget - w_bytes, per_row) // per_row) // sub * sub
        tm = int(min(max(tm, sub), 4096))
    # Never exceed the (sublane-rounded) batch.
    tm = min(tm, _round_up(batch, sub))
    # Keep >= 2 grid blocks when B allows it so ("parallel",) can use both
    # TensorCores on v7x (a single block would idle the second core).
    if batch > sub:
        tm = min(tm, max(sub, _round_up(pl.cdiv(batch, 2), sub)))
    return tm


@functools.partial(jax.jit, static_argnames=("block_b", "compute_dtype"))
def mvg_forward_fused(x, w_cat, b_cat, *, block_b=None, compute_dtype=None):
    """x: [B, D_in]; w_cat: [D_in, 2*D_out]; b_cat: [1, 2*D_out] float32.

    Returns (mu, sigma), each [B, D_out] float32.
    """
    B, D_in = x.shape
    D2 = w_cat.shape[1]
    D_out = D2 // 2

    if compute_dtype is not None:
        # bf16 boundary cast: halves HBM read traffic / MXU passes for large
        # D_in / D_out; the in-kernel dot still accumulates in f32.
        x = x.astype(compute_dtype)
        w_cat = w_cat.astype(compute_dtype)
    in_itemsize = jnp.dtype(x.dtype).itemsize

    tm = _pick_row_tile(B, D_in, D_out, in_itemsize, block_b)
    num_blocks = pl.cdiv(B, tm)        # ragged last block: OOB writes are masked

    w_bytes = int(w_cat.size) * in_itemsize
    cost = pl.CostEstimate(
        flops=2 * B * D_in * D2,
        transcendentals=B * D_out,
        bytes_accessed=int(x.size) * in_itemsize + w_bytes
        + int(b_cat.size) * 4 + 2 * B * D_out * 4,
    )

    # VMEM actually needed (double-buffered operands) plus headroom, capped
    # below v7x's 64 MiB physical VMEM.
    vmem_needed = 2 * (tm * D_in * in_itemsize + 2 * tm * D_out * 4
                       + w_bytes + D2 * 4)
    vmem_limit = int(min(max(2 * vmem_needed, 32 * 1024 * 1024),
                         48 * 1024 * 1024))

    grid_spec = pl.GridSpec(
        grid=(num_blocks,),
        in_specs=[
            pl.BlockSpec((tm, D_in), lambda i: (i, 0)),
            # TODO(synk): pipeline_mode=pl.Buffered(1) on these grid-invariant
            # weight/bias blocks would drop their second VMEM buffer; left at
            # the default for portability across jax versions.
            pl.BlockSpec((D_in, D2), lambda i: (0, 0)),
            pl.BlockSpec((1, D2), lambda i: (0, 0)),
        ],
        out_specs=(
            pl.BlockSpec((tm, D_out), lambda i: (i, 0)),
            pl.BlockSpec((tm, D_out), lambda i: (i, 0)),
        ),
    )

    mu, sigma = pl.pallas_call(
        _mvg_kernel,
        grid_spec=grid_spec,
        out_shape=(jax.ShapeDtypeStruct((B, D_out), jnp.float32),
                   jax.ShapeDtypeStruct((B, D_out), jnp.float32)),
        compiler_params=pltpu.CompilerParams(
            dimension_semantics=("parallel",),
            vmem_limit_bytes=vmem_limit),
        cost_estimate=cost,
    )(x, w_cat, b_cat)
    return mu, sigma


def mvg_forward(x, w_mu, b_mu, w_sigma, b_sigma, **kwargs):
    """Convenience wrapper taking the PyTorch module's parameter layout.

    Prefer fusing once at init (fuse_params) and calling mvg_forward_fused so
    the weight concat is not paid on every forward call.
    """
    w_cat, b_cat = fuse_params(w_mu, b_mu, w_sigma, b_sigma)
    return mvg_forward_fused(x, w_cat, b_cat, **kwargs)


# ----------------------------- reference & demo -----------------------------

def reference_forward(x, w_mu, b_mu, w_sigma, b_sigma):
    hp = jax.lax.Precision.HIGHEST
    mu = jnp.dot(x, w_mu, precision=hp) + b_mu
    s = jnp.dot(x, w_sigma, precision=hp) + b_sigma
    sigma = jnp.where(s > 0, s, jnp.exp(s) - 1.0) + 1.0 + MIN_P   # elu(s)+1+min_p
    return mu, sigma


def _make_params(key, d_in, d_out):
    kwm, kbm, kws, kbs = jax.random.split(key, 4)
    # weights_init: normal(0, 0.01); PyTorch Linear bias default:
    # uniform(-1/sqrt(fan_in), 1/sqrt(fan_in)).
    w_mu = 0.01 * jax.random.normal(kwm, (d_in, d_out), dtype=jnp.float32)
    w_sigma = 0.01 * jax.random.normal(kws, (d_in, d_out), dtype=jnp.float32)
    bound = 1.0 / (d_in ** 0.5)
    b_mu = jax.random.uniform(kbm, (d_out,), minval=-bound, maxval=bound,
                              dtype=jnp.float32)
    b_sigma = jax.random.uniform(kbs, (d_out,), minval=-bound, maxval=bound,
                                 dtype=jnp.float32)
    return w_mu, b_mu, w_sigma, b_sigma


if __name__ == "__main__":
    key = jax.random.PRNGKey(0)
    kx1, kx2, kp = jax.random.split(key, 3)

    D_in, D_out = 32, 16
    w_mu, b_mu, w_sigma, b_sigma = _make_params(kp, D_in, D_out)
    # Fuse the two heads ONCE (module init), not per forward call.
    w_cat, b_cat = fuse_params(w_mu, b_mu, w_sigma, b_sigma)

    def check(mu, sigma, x, atol, rtol):
        mu_ref, sigma_ref = reference_forward(x, w_mu, b_mu, w_sigma, b_sigma)
        assert mu.shape == mu_ref.shape and sigma.shape == sigma_ref.shape
        assert jnp.allclose(mu, mu_ref, atol=atol, rtol=rtol), "mu mismatch"
        assert jnp.allclose(sigma, sigma_ref, atol=atol, rtol=rtol), "sigma mismatch"
        assert bool(jnp.all(sigma > 0)), "sigma not strictly positive"

    # --- small batch: single grid block ---
    B = 8
    x = jax.random.normal(kx1, (B, D_in), dtype=jnp.float32)
    mu, sigma = mvg_forward_fused(x, w_cat, b_cat)
    jax.block_until_ready((mu, sigma))
    check(mu, sigma, x, atol=1e-4, rtol=1e-4)

    # --- larger batch: multiple blocks, ragged last block (no pad/trim), and a
    # non-multiple-of-8 block_b that gets rounded internally ---
    B2 = 300
    x2 = jax.random.normal(kx2, (B2, D_in), dtype=jnp.float32)
    mu2, sigma2 = mvg_forward_fused(x2, w_cat, b_cat, block_b=100)
    jax.block_until_ready((mu2, sigma2))
    check(mu2, sigma2, x2, atol=1e-4, rtol=1e-4)

    # --- bf16 compute path: inputs/weights cast at the boundary, f32 accum ---
    mu3, sigma3 = mvg_forward_fused(x2, w_cat, b_cat,
                                    compute_dtype=jnp.bfloat16)
    jax.block_until_ready((mu3, sigma3))
    check(mu3, sigma3, x2, atol=2e-2, rtol=2e-2)

    print("KERNEL_OK")
</pallas_src>

<mosaic_0001>
module attributes {stable_mosaic.version = 11 : i64} {
  func.func @_mvg_kernel(%arg0: i32, %arg1: memref<8x32xf32, #tpu.memory_space<vmem>>, %arg2: memref<32x32xf32, #tpu.memory_space<vmem>>, %arg3: memref<1x32xf32, #tpu.memory_space<vmem>>, %arg4: memref<8x16xf32, #tpu.memory_space<vmem>>, %arg5: memref<8x16xf32, #tpu.memory_space<vmem>>) attributes {dimension_semantics = [#tpu.dimension_semantics<parallel>], iteration_bounds = array<i64: 1>, scalar_prefetch = 0 : i64, scratch_operands = 0 : i64, tpu.core_type = #tpu.core_type<tc>, window_params = [{transform_indices = @transform_0, window_bounds = array<i64: 8, 32>}, {pipeline_mode = #tpu.pipeline_mode<synchronous>, transform_indices = @transform_1, window_bounds = array<i64: 32, 32>}, {pipeline_mode = #tpu.pipeline_mode<synchronous>, transform_indices = @transform_2, window_bounds = array<i64: 1, 32>}, {transform_indices = @transform_3, window_bounds = array<i64: 8, 16>}, {transform_indices = @transform_4, window_bounds = array<i64: 8, 16>}]} {
    %c0 = arith.constant 0 : index
    %c0_0 = arith.constant 0 : index
    %0 = vector.load %arg1[%c0, %c0_0] : memref<8x32xf32, #tpu.memory_space<vmem>>, vector<8x32xf32>
    %c0_1 = arith.constant 0 : index
    %c0_2 = arith.constant 0 : index
    %1 = vector.load %arg2[%c0_1, %c0_2] : memref<32x32xf32, #tpu.memory_space<vmem>>, vector<32x32xf32>
    %cst = arith.constant dense<0.000000e+00> : vector<8x32xf32>
    %2 = tpu.matmul %0, %1, %cst {dimension_numbers = #tpu.dot_dimension_numbers<[1], [0], [0], [1], [0, 0, 1, 1], [], []>} : vector<8x32xf32>, vector<32x32xf32>, vector<8x32xf32> -> vector<8x32xf32>
    %c0_3 = arith.constant 0 : index
    %c0_4 = arith.constant 0 : index
    %3 = vector.load %arg3[%c0_3, %c0_4] : memref<1x32xf32, #tpu.memory_space<vmem>>, vector<1x32xf32>
    %4 = vector.broadcast %3 : vector<1x32xf32> to vector<8x32xf32>
    %5 = arith.addf %2, %4 : vector<8x32xf32>
    %6 = vector.extract_strided_slice %5 {offsets = [0, 0], sizes = [8, 16], strides = [1, 1]} : vector<8x32xf32> to vector<8x16xf32>
    %c0_5 = arith.constant 0 : index
    %c0_6 = arith.constant 0 : index
    %7 = vector.load %arg4[%c0_5, %c0_6] : memref<8x16xf32, #tpu.memory_space<vmem>>, vector<8x16xf32>
    tpu.vector_store %arg4[%c0_5, %c0_6], %6 {strides = array<i32>} : memref<8x16xf32, #tpu.memory_space<vmem>>, vector<8x16xf32>,
    %8 = vector.extract_strided_slice %5 {offsets = [0, 16], sizes = [8, 16], strides = [1, 1]} : vector<8x32xf32> to vector<8x16xf32>
    %cst_7 = arith.constant 0.000000e+00 : f32
    %9 = vector.broadcast %cst_7 : f32 to vector<8x16xf32>
    %10 = arith.cmpf ogt, %8, %9 : vector<8x16xf32>
    %cst_8 = arith.constant 1.000000e+00 : f32
    %11 = vector.broadcast %cst_8 : f32 to vector<8x16xf32>
    %12 = arith.addf %8, %11 : vector<8x16xf32>
    %13 = math.exp %8 : vector<8x16xf32>
    %14 = arith.select %10, %12, %13 : vector<8x16xi1>, vector<8x16xf32>
    %cst_9 = arith.constant 9.99999996E-12 : f32
    %15 = vector.broadcast %cst_9 : f32 to vector<8x16xf32>
    %16 = arith.addf %14, %15 : vector<8x16xf32>
    %c0_10 = arith.constant 0 : index
    %c0_11 = arith.constant 0 : index
    %17 = vector.load %arg5[%c0_10, %c0_11] : memref<8x16xf32, #tpu.memory_space<vmem>>, vector<8x16xf32>
    tpu.vector_store %arg5[%c0_10, %c0_11], %16 {strides = array<i32>} : memref<8x16xf32, #tpu.memory_space<vmem>>, vector<8x16xf32>,
    return
  }
  func.func @transform_0(%arg0: i32) -> (i32, i32) {
    %c0_i32 = arith.constant 0 : i32
    %c0_i32_0 = arith.constant 0 : i32
    return %arg0, %c0_i32 : i32, i32
  }
  func.func @transform_1(%arg0: i32) -> (i32, i32) {
    %c0_i32 = arith.constant 0 : i32
    %c0_i32_0 = arith.constant 0 : i32
    %c0_i32_1 = arith.constant 0 : i32
    return %c0_i32, %c0_i32_0 : i32, i32
  }
  func.func @transform_2(%arg0: i32) -> (i32, i32) {
    %c0_i32 = arith.constant 0 : i32
    %c0_i32_0 = arith.constant 0 : i32
    %c0_i32_1 = arith.constant 0 : i32
    return %c0_i32, %c0_i32_0 : i32, i32
  }
  func.func @transform_3(%arg0: i32) -> (i32, i32) {
    %c0_i32 = arith.constant 0 : i32
    %c0_i32_0 = arith.constant 0 : i32
    return %arg0, %c0_i32 : i32, i32
  }
  func.func @transform_4(%arg0: i32) -> (i32, i32) {
    %c0_i32 = arith.constant 0 : i32
    %c0_i32_0 = arith.constant 0 : i32
    return %arg0, %c0_i32 : i32, i32
  }
}

</mosaic_0001>

<bundles_post_ra>
// kernel: mvg_forward_fused.1
= control target key start
LH: loop header
LB: loop body
LE: loop exit
PB: predicated region body
PF: predicated region fallthrough
CT: control target
= control target key end

     0   :  { %10 = vsyncpa [#allocation3], 0  ;;  %s341_s0 = inlined_call_operand.hbm [shape: f32[8,32], index: 0, kind: input, shape index: {}]   ;;  %s342_s1 = inlined_call_operand.hbm [shape: f32[32,32], index: 1, kind: input, shape index: {}]   ;;  %s343_s2 = inlined_call_operand.vmem [shape: f32[1,32], index: 2, kind: input, shape index: {}]   ;;  %s344_s3 = inlined_call_operand.hbm [shape: f32[8,16], index: 3, kind: output, shape index: {0}]   ;;  %s345_s4 = inlined_call_operand.hbm [shape: f32[8,16], index: 4, kind: output, shape index: {1}]  }
   0x1   :  { %11 = vsyncpa [#allocation6], 0 }
   0x2   :  { %12 = vsyncpa [#allocation4], 0 }
   0x3   :  { %13 = vsyncpa [#allocation9], 0  ;;  %s290_s15 = smov [#allocation2]   ;;  %s291_s17 = smov [#allocation5]  }
   0x4   :  { %s20_s16 = sshll.u32 %s290_s15, 4  ;;  %s29_s18 = sshll.u32 %s291_s17, 4  ;;  %s21_s16 = int_to_ptr.vmem [resolvable:$true] %s20_s16  ;;  %s30_s18 = int_to_ptr.vmem [resolvable:$true] %s29_s18 }
   0x5   :  { %s210_s19 = scalar_lea.vmem %s21_s16, 128  ;;  %p215_p1 = scmp.lt.s32.totalorder %s21_s16, %s21_s16 }
   0x6   :  { %p211_p0 = scmp.ne.s32.totalorder %s21_s16, %s210_s19  ;;  %p216_p2 = scmp.lt.s32.totalorder %s210_s19, %s210_s19 }
   0x8   :  { %p217_p3 = por %p216_p2, %p215_p1 }
   0xa   :  { %p218_p4 = pnand %p217_p3, %p211_p0 }
   0xc   :  { %221 = shalt.err (!%p218_p4)
}
   0xd   :  { %23 = dma.hbm_to_vmem [thread:$0]  %s341_s0, 128, %s21_s16, [#allocation3]  }
   0xe   :  { %s230_s22 = scalar_lea.vmem %s30_s18, 512  ;;  %p235_p6 = scmp.lt.s32.totalorder %s30_s18, %s30_s18 }
   0xf   :  { %p231_p5 = scmp.ne.s32.totalorder %s30_s18, %s230_s22  ;;  %p236_p7 = scmp.lt.s32.totalorder %s230_s22, %s230_s22 }
  0x11   :  { %p237_p8 = por %p236_p7, %p235_p6 }
  0x13   :  { %p238_p9 = pnand %p237_p8, %p231_p5 }
  0x15   :  { %241 = shalt.err (!%p238_p9)
}
  0x16   :  { %s292_s23 = smov 128   ;;  %s293_s24 = smov 8  }
  0x17   :  { %35 = dma.hbm_to_vmem [thread:$0]  %s342_s1, 512, %s30_s18, [#allocation6], %s292_s23, %s292_s23, %s293_s24  }
  0x18   :  { %282 = dma.done.wait [#allocation3], 128  }
  0x19   :  { %283 = vsyncadd [#allocation3], 4294967168 }
  0x1a   :  { %284 = dma.done.wait [#allocation6], 512  }
  0x1b   :  { %285 = vsyncadd [#allocation6], 4294966784  ;;  %v294_v0 = vmov 0.0   ;;  %vm295_vm0 = vmmov 0   ;;  %v48_v1 = vld [vmem:[#allocation5 + $0x18] sm:$0xff]  ;;  %v47_v2 = vld [vmem:[#allocation5 + $0x10] sm:$0xff] }
  0x1c   :  { %180 = vmatprep.subr.mxu0 %v294_v0  ;;  %188 = vmatprep.mubr.msk.f32.mxu0 %vm295_vm0, %v294_v0  ;;  %v46_v3 = vld [vmem:[#allocation5 + $0x8] sm:$0xff]  ;;  %v45_v4 = vld [vmem:[#allocation5] sm:$0xff]  ;;  %v44_v5 = vld [vmem:[#allocation2] sm:$0xff]  ;;  %vm56_vm1 = vcmask 261120   ;;  %vm130_vm2 = vcmask 130048   ;;  %s296_s27 = smov [#allocation7]  }
  0x1d   :  { %181 = vmatpush3.msra.mxu0 %v48_v1  ;;  %v173_v6 = vld [vmem:[%s343_s2] ss:$0 sm:$0xff]  ;;  %s149_s28 = sshll.u32 %s296_s27, 4  ;;  %s150_s28 = int_to_ptr.vmem [resolvable:$true] %s149_s28 }
  0x1e   :  { %182 = vmatprep.subr.mxu0 %v294_v0  ;;  %s242_s29 = scalar_lea.vmem %s150_s28, 128  ;;  %p247_p11 = scmp.lt.s32.totalorder %s150_s28, %s150_s28 }
  0x1f   :  { %183 = vmatpush3.msra.mxu0 %v47_v2  ;;  %p243_p10 = scmp.ne.s32.totalorder %s150_s28, %s242_s29  ;;  %p248_p12 = scmp.lt.s32.totalorder %s242_s29, %s242_s29 }
  0x20   :  { %184 = vmatprep.subr.mxu0 %v294_v0 }
  0x21   :  { %185 = vmatpush3.msra.mxu0 %v46_v3  ;;  %p249_p13 = por %p248_p12, %p247_p11 }
  0x22   :  { %186 = vmatprep.subr.mxu0 %v294_v0 }
  0x23   :  { %187 = vmatpush3.msra.mxu0 %v45_v4  ;;  %p250_p0 = pnand %p249_p13, %p243_p10 }
  0x24   :  { %189 = vmatmul.mubr.msk.f32.vlgmr.msra.gmra.mxu0 %vm56_vm1, %v44_v5 }
  0xe4   :  { %v126_v7 = vpop.f32.mrf.mxu0 }
  0xe5   :  { %v127_v8 = vadd.f32 %v173_v6, %v126_v7 }
  0xe6   :  { %v190_v9 = vpop.f32.mrf.mxu0 }
  0xe7   :  { %v134_v10 = vmul.f32 1.442695, %v127_v8  ;;  %131 = vst.msk [vmem:[#allocation7] sm:$0xff] %vm130_vm2, %v127_v8 }
  0xe9   :  { %200 = vpow2.f32 %v134_v10 }
  0xea   :  { %253 = shalt.err (!%p250_p0)
}
  0xeb   :  { %152 = dma.vmem_to_hbm [thread:$0]  %s150_s28, 128, %s344_s3, [#allocation4]   ;;  %v133_v11 = vadd.f32 1.0, %v127_v8  ;;  %vm132_vm3 = vcmp.gt.f32.partialorder %v127_v8, 0.0 }
  0xec   :  { %s297_s5 = smov 112   ;;  %s298_s6 = smov [#allocation8]  }
  0xed   :  { %s159_s7 = sshll.u32 %s298_s6, 4  ;;  %s160_s7 = int_to_ptr.vmem [resolvable:$true] %s159_s7 }
  0xee   :  { %s262_s8 = scalar_lea.vmem %s160_s7, 128  ;;  %p267_p2 = scmp.lt.s32.totalorder %s160_s7, %s160_s7 }
  0xef   :  { %p263_p1 = scmp.ne.s32.totalorder %s160_s7, %s262_s8  ;;  %p268_p3 = scmp.lt.s32.totalorder %s262_s8, %s262_s8 }
  0xf1   :  { %p269_p4 = por %p268_p3, %p267_p2 }
  0xf3   :  { %p270_p5 = pnand %p269_p4, %p263_p1 }
  0xf6   :  { %v201_v12 = vpop.eup %200 }
  0xf7   :  { %v136_v13 = vsel %vm132_vm3, %v133_v11, %v201_v12 }
  0xf8   :  { %v137_v14 = vadd.f32 1e-11, %v136_v13 }
  0xfa   :  { %139 = vrot.lane.b32.xlu0 %v137_v14, %s297_s5 }
 0x16c   :  { %v140_v15 = vpop.permute.xlu0 %139 }
 0x16d   :  { %142 = vst.msk [vmem:[#allocation8] sm:$0xff] %vm130_vm2, %v140_v15 }
 0x16e   :  { %273 = shalt.err (!%p270_p5)
}
 0x16f   :  { %162 = dma.vmem_to_hbm [thread:$0]  %s160_s7, 128, %s345_s4, [#allocation9]  }
 0x170   :  { %286 = dma.done.wait [#allocation4], 128  }
 0x171   :  { %287 = vsyncadd [#allocation4], 4294967168 }
 0x172   :  { %288 = dma.done.wait [#allocation9], 128  }
 0x173   :  { %289 = vsyncadd [#allocation9], 4294967168 }
 0x174   :  { %169 = vsyncpa [#allocation3], 1 }
 0x175   :  { %170 = vsyncpa [#allocation6], 1 }
 0x176   :  { %171 = vsyncpa [#allocation4], 1 }
 0x177   :  { %172 = vsyncpa [#allocation9], 1 }

</bundles_post_ra>
